<compile_context>
chip_gen: v5e
topology: v5e:2x2
jax: 0.10.0
libtpu: 0.0.40
codegen_flags: <defaults>
</compile_context>

<pallas_src>
import jax
import jax.numpy as jnp
from jax.experimental import pallas as pl
from jax.experimental.pallas import tpu as pltpu


def _round_up(x, m):
    return ((x + m - 1) // m) * m


def gmf_kernel(u_ref, i_ref, w_ref, b_ref, out_ref):
    # u_ref, i_ref : (TB, F) pre-gathered embedding rows (VMEM, f32 or bf16)
    # w_ref        : (1, F)  predict-layer weight row (VMEM, resident, f32)
    # b_ref        : (1,)    predict-layer bias (SMEM scalar, f32)
    # out_ref      : (1, TB) lane-dense output block (f32)
    u = u_ref[...].astype(jnp.float32)
    it = i_ref[...].astype(jnp.float32)
    prod = u * it * w_ref[...]                               # (TB, F), VPU only
    out_ref[...] = (jnp.sum(prod, axis=-1) + b_ref[0]).reshape(1, -1)


def _choose_tb(B, F, itemsize, *, target_bytes=2 << 20, vmem_budget=16 << 20):
    """Pick the batch tile TB (all-static Python math; runs at trace time)."""
    # ~target_bytes of activation DMA per grid step (2 slabs of TB*F*itemsize).
    tb = max(128, (target_bytes // (2 * F * itemsize)) // 128 * 128)
    # Cap the double-buffered footprint (2 inputs x 2 buffers x TB*F*itemsize)
    # so the tile fits comfortably on every generation (incl. v7x's 64 MiB).
    tb_cap = max(128, (vmem_budget // (4 * F * itemsize)) // 128 * 128)
    tb = min(tb, tb_cap)
    if B <= tb:
        if B >= 256:
            # Keep >= 2 grid steps so the "parallel" batch axis can shard
            # across v7x's two TensorCores instead of collapsing to one step.
            tb = _round_up(pl.cdiv(B, 2), 128)
        else:
            # Single block equal to the full array dims (no (8,128) constraint
            # applies in that case); tiny batches stay a one-step kernel.
            tb = B
    return tb


@jax.jit
def gmf_forward(user_idx, item_idx, user_table, item_table, w, b):
    """user_idx, item_idx: int32 (B,); returns f32 (B,) predictions."""
    B = user_idx.shape[0]
    F = user_table.shape[1]
    itemsize = jnp.dtype(user_table.dtype).itemsize

    # One bulk XLA gather per table (instead of B tiny per-row DMAs); keep the
    # table dtype (f32 or bf16) -- the kernel casts to f32 internally.
    u = jnp.take(user_table, user_idx, axis=0)       # (B, F)
    it = jnp.take(item_table, item_idx, axis=0)      # (B, F)

    tb = _choose_tb(B, F, itemsize)
    grid = pl.cdiv(B, tb)                            # ragged last block masked

    w_row = w.reshape(1, F).astype(jnp.float32)      # lane-major weight row
    b_vec = b.reshape(1).astype(jnp.float32)         # scalar bias -> SMEM

    grid_spec = pltpu.PrefetchScalarGridSpec(
        num_scalar_prefetch=0,
        grid=(grid,),
        in_specs=[
            pl.BlockSpec((tb, F), lambda i: (i, 0)),             # user rows
            pl.BlockSpec((tb, F), lambda i: (i, 0)),             # item rows
            pl.BlockSpec((1, F), lambda i: (0, 0)),              # weight row
            pl.BlockSpec(memory_space=pltpu.MemorySpace.SMEM),   # bias
        ],
        out_specs=pl.BlockSpec((1, tb), lambda i: (0, i)),
    )

    cost = pl.CostEstimate(
        flops=3 * B * F,
        transcendentals=0,
        bytes_accessed=2 * B * F * itemsize + B * 4 + F * 4 + 4,
    )

    out = pl.pallas_call(
        gmf_kernel,
        out_shape=jax.ShapeDtypeStruct((1, B), jnp.float32),
        grid_spec=grid_spec,
        compiler_params=pltpu.CompilerParams(
            # Independent (1, TB) output blocks -> shard batch across TCs (v7x).
            dimension_semantics=("parallel",),
            # Explicit scoped-VMEM limit: above v5e's 16 MiB default, well
            # under v7x's 64 MiB physical.  Per-step footprint is only a few
            # MiB thanks to the TB cap in _choose_tb.
            vmem_limit_bytes=32 << 20,
        ),
        cost_estimate=cost,
    )(u, it, w_row, b_vec)

    return out.reshape(-1)          # matches prediction.view(-1)


def init_params(key, user_num, item_num, factor_num):
    k1, k2, k3 = jax.random.split(key, 3)
    # nn.init.normal_(std=0.01) for both embedding tables
    user_table = 0.01 * jax.random.normal(k1, (user_num, factor_num), jnp.float32)
    item_table = 0.01 * jax.random.normal(k2, (item_num, factor_num), jnp.float32)
    # kaiming_uniform_(a=1, nonlinearity='sigmoid') -> gain=1, bound=sqrt(3/fan_in)
    bound = jnp.sqrt(3.0 / factor_num)
    w = jax.random.uniform(k3, (1, factor_num), jnp.float32, -bound, bound)
    b = jnp.zeros((1,), jnp.float32)
    return user_table, item_table, w, b


def gmf_reference(user_idx, item_idx, user_table, item_table, w, b):
    u = user_table[user_idx].astype(jnp.float32)     # (B, F)
    i = item_table[item_idx].astype(jnp.float32)     # (B, F)
    pred = (u * i) @ w.T + b                         # (B, 1)
    return pred.reshape(-1)


if __name__ == "__main__":
    user_num, item_num, factor_num = 10, 12, 32

    key = jax.random.PRNGKey(0)
    kp, ku, ki, ku2, ki2 = jax.random.split(key, 5)
    user_table, item_table, w, b = init_params(kp, user_num, item_num, factor_num)

    # Test 1: small batch -> single grid step, block == full array, no padding.
    batch = 8
    user_idx = jax.random.randint(ku, (batch,), 0, user_num, dtype=jnp.int32)
    item_idx = jax.random.randint(ki, (batch,), 0, item_num, dtype=jnp.int32)

    out = gmf_forward(user_idx, item_idx, user_table, item_table, w, b)
    jax.block_until_ready(out)
    ref = gmf_reference(user_idx, item_idx, user_table, item_table, w, b)
    assert out.shape == (batch,)
    assert jnp.allclose(out, ref, atol=1e-5, rtol=1e-5), (out, ref)

    # Test 2: medium batch -> >= 2 grid steps (v7x dual-TC path) with a ragged
    # boundary block (no jnp.pad; Pallas masks the partial load/store).
    batch2 = 300
    user_idx2 = jax.random.randint(ku2, (batch2,), 0, user_num, dtype=jnp.int32)
    item_idx2 = jax.random.randint(ki2, (batch2,), 0, item_num, dtype=jnp.int32)

    out2 = gmf_forward(user_idx2, item_idx2, user_table, item_table, w, b)
    jax.block_until_ready(out2)
    ref2 = gmf_reference(user_idx2, item_idx2, user_table, item_table, w, b)
    assert out2.shape == (batch2,)
    assert jnp.allclose(out2, ref2, atol=1e-5, rtol=1e-5), (out2, ref2)

    # Test 3: bf16 embedding tables (halved HBM read traffic); kernel casts to
    # f32 internally so the math matches the f32 reference on bf16 inputs.
    ut16 = user_table.astype(jnp.bfloat16)
    it16 = item_table.astype(jnp.bfloat16)
    out3 = gmf_forward(user_idx2, item_idx2, ut16, it16, w, b)
    jax.block_until_ready(out3)
    ref3 = gmf_reference(user_idx2, item_idx2, ut16, it16, w, b)
    assert out3.shape == (batch2,)
    assert jnp.allclose(out3, ref3, atol=1e-5, rtol=1e-5), (out3, ref3)

    print("KERNEL_OK")
</pallas_src>

<mosaic_0001>
module attributes {stable_mosaic.version = 11 : i64} {
  func.func @gmf_kernel(%arg0: i32, %arg1: memref<8x32xf32, #tpu.memory_space<vmem>>, %arg2: memref<8x32xf32, #tpu.memory_space<vmem>>, %arg3: memref<1x32xf32, #tpu.memory_space<vmem>>, %arg4: memref<1xf32, #tpu.memory_space<smem>>, %arg5: memref<1x8xf32, #tpu.memory_space<vmem>>) attributes {dimension_semantics = [#tpu.dimension_semantics<parallel>], iteration_bounds = array<i64: 1>, scalar_prefetch = 0 : i64, scratch_operands = 0 : i64, tpu.core_type = #tpu.core_type<tc>, window_params = [{transform_indices = @transform_0, window_bounds = array<i64: 8, 32>}, {transform_indices = @transform_1, window_bounds = array<i64: 8, 32>}, {pipeline_mode = #tpu.pipeline_mode<synchronous>, transform_indices = @transform_2, window_bounds = array<i64: 1, 32>}, {transform_indices = @transform_3, window_bounds = array<i64: 1>}, {transform_indices = @transform_4, window_bounds = array<i64: 1, 8>}]} {
    %c0 = arith.constant 0 : index
    %c0_0 = arith.constant 0 : index
    %0 = vector.load %arg1[%c0, %c0_0] : memref<8x32xf32, #tpu.memory_space<vmem>>, vector<8x32xf32>
    %c0_1 = arith.constant 0 : index
    %c0_2 = arith.constant 0 : index
    %1 = vector.load %arg2[%c0_1, %c0_2] : memref<8x32xf32, #tpu.memory_space<vmem>>, vector<8x32xf32>
    %2 = arith.mulf %0, %1 : vector<8x32xf32>
    %c0_3 = arith.constant 0 : index
    %c0_4 = arith.constant 0 : index
    %3 = vector.load %arg3[%c0_3, %c0_4] : memref<1x32xf32, #tpu.memory_space<vmem>>, vector<1x32xf32>
    %4 = vector.broadcast %3 : vector<1x32xf32> to vector<8x32xf32>
    %5 = arith.mulf %2, %4 : vector<8x32xf32>
    %cst = arith.constant dense<0.000000e+00> : vector<8xf32>
    %6 = vector.multi_reduction <add>, %5, %cst [1] : vector<8x32xf32> to vector<8xf32>
    %c0_5 = arith.constant 0 : index
    %7 = memref.load %arg4[%c0_5] : memref<1xf32, #tpu.memory_space<smem>>
    %8 = vector.broadcast %7 : f32 to vector<8xf32>
    %9 = arith.addf %6, %8 : vector<8xf32>
    %10 = vector.shape_cast %9 : vector<8xf32> to vector<1x8xf32>
    %c0_6 = arith.constant 0 : index
    %c0_7 = arith.constant 0 : index
    %11 = vector.load %arg5[%c0_6, %c0_7] : memref<1x8xf32, #tpu.memory_space<vmem>>, vector<1x8xf32>
    tpu.vector_store %arg5[%c0_6, %c0_7], %10 {strides = array<i32>} : memref<1x8xf32, #tpu.memory_space<vmem>>, vector<1x8xf32>,
    return
  }
  func.func @transform_0(%arg0: i32) -> (i32, i32) {
    %c0_i32 = arith.constant 0 : i32
    %c0_i32_0 = arith.constant 0 : i32
    return %arg0, %c0_i32 : i32, i32
  }
  func.func @transform_1(%arg0: i32) -> (i32, i32) {
    %c0_i32 = arith.constant 0 : i32
    %c0_i32_0 = arith.constant 0 : i32
    return %arg0, %c0_i32 : i32, i32
  }
  func.func @transform_2(%arg0: i32) -> (i32, i32) {
    %c0_i32 = arith.constant 0 : i32
    %c0_i32_0 = arith.constant 0 : i32
    %c0_i32_1 = arith.constant 0 : i32
    return %c0_i32, %c0_i32_0 : i32, i32
  }
  func.func @transform_3(%arg0: i32) -> i32 {
    %c0_i32 = arith.constant 0 : i32
    %c0_i32_0 = arith.constant 0 : i32
    return %c0_i32 : i32
  }
  func.func @transform_4(%arg0: i32) -> (i32, i32) {
    %c0_i32 = arith.constant 0 : i32
    %c0_i32_0 = arith.constant 0 : i32
    return %c0_i32, %arg0 : i32, i32
  }
}

</mosaic_0001>

<bundles_post_ra>
// kernel: gmf_forward.1
= control target key start
LH: loop header
LB: loop body
LE: loop exit
PB: predicated region body
PF: predicated region fallthrough
CT: control target
= control target key end

     0   :  { %s126_s0 = inlined_call_operand.vmem [shape: f32[8,32], index: 0, kind: input, shape index: {}]   ;;  %s127_s1 = inlined_call_operand.vmem [shape: f32[8,32], index: 1, kind: input, shape index: {}]   ;;  %s128_s2 = inlined_call_operand.vmem [shape: f32[1,32], index: 2, kind: input, shape index: {}]   ;;  %s129_s3 = inlined_call_operand.<no memory space> [shape: f32[1], index: 3, kind: input, shape index: {}]   ;;  %s130_s4 = inlined_call_operand.hbm [shape: f32[1,8], index: 4, kind: output, shape index: {}]  }
   0x1   :  { %v19_v0 = vld [vmem:[%s126_s0] sm:$0xff] }
   0x2   :  { %v20_v1 = vld [vmem:[%s127_s1] sm:$0xff] }
   0x3   :  { %v21_v2 = vmul.f32 %v20_v1, %v19_v0  ;;  %v58_v3 = vld [vmem:[%s128_s2] ss:$0 sm:$0xff] }
   0x4   :  { %10 = vsyncpa [#allocation4], 0  ;;  %vm27_vm0 = vcmask 261120   ;;  %v35_v6 = vlaneseq  ;;  %v32_v7 = vstv %s129_s3  ;;  %s85_s0 = smov [#allocation3]   ;;  %s48_s25 = sshll.u32 %s130_s4, 4  ;;  %vm39_vm1 = vcmask 57344   ;;  %s49_s25 = int_to_ptr.hbm [resolvable:$true] %s48_s25 }
   0x5   :  { %v26_v4 = vmul.f32 %v58_v3, %v21_v2  ;;  %s46_s23 = sshll.u32 %s85_s0, 4  ;;  %s47_s23 = int_to_ptr.vmem [resolvable:$true] %s46_s23 }
   0x6   :  { %v36_v8 = vand.u32 127, %v35_v6 }
   0x7   :  { %v28_v5 = vsel %vm27_vm0, %v26_v4, 0.0 }
   0x8   :  { %29 = vadd.xlane.f32.xlu0 %v28_v5 }
  0x7b   :  { %v30_v9 = vpop.xlane.xlu0 %29 }
  0x7c   :  { %v33_v10 = vadd.f32 %v32_v7, %v30_v9 }
  0x7e   :  { %v37_v11 = vperm.slane %v33_v10, %v36_v8 }
  0x80   :  { %40 = vst.msk [vmem:[#allocation3] sm:$0x1] %vm39_vm1, %v37_v11 }
  0x81   :  { %51 = dma.vmem_to_hbm [thread:$0]  %s47_s23, 16, %s49_s25, [#allocation4]  }
  0x82   :  { %83 = dma.done.wait [#allocation4], 16  }
  0x83   :  { %84 = vsyncadd [#allocation4], 4294967280 }
  0x84   :  { %56 = vsyncpa [#allocation4], 1 }

</bundles_post_ra>
